<compile_context>
chip_gen: v6e
topology: v6e:2x2x1
jax: 0.10.0
libtpu: 0.0.40
codegen_flags: <defaults>
</compile_context>

<pallas_src>
import functools

import jax
import jax.numpy as jnp
import numpy as np
from jax.experimental import pallas as pl
from jax.experimental.pallas import tpu as pltpu

_HID = 128  # padded hidden width (real hidden widths are 64 / 128 / 64)


def _make_kernel(compute_dtype):
    dt = compute_dtype

    def kernel(x_ref, w1_ref, b1_ref, w2_ref, b2_ref, w3_ref, b3_ref,
               w4_ref, b4_ref, o_ref):
        h = x_ref[...].astype(dt)
        h = jnp.maximum(
            jnp.dot(h, w1_ref[...], preferred_element_type=jnp.float32)
            + b1_ref[...], 0.0)
        h = jnp.maximum(
            jnp.dot(h.astype(dt), w2_ref[...],
                    preferred_element_type=jnp.float32) + b2_ref[...], 0.0)
        h = jnp.maximum(
            jnp.dot(h.astype(dt), w3_ref[...],
                    preferred_element_type=jnp.float32) + b3_ref[...], 0.0)
        # fc4 (128 -> 1): contract w4 row against h's feature dim ("NT" matmul,
        # i.e. w4_row @ h.T) so the result lands lane-major as a (1, TM) row ->
        # lane-dense store instead of a masked (TM, 1) column.
        v = jax.lax.dot_general(
            w4_ref[...], h,
            dimension_numbers=(((1,), (1,)), ((), ())),
            preferred_element_type=jnp.float32)          # (1, TM)
        o_ref[...] = v + b4_ref[0, 0]

    return kernel


def _pad2(a, rows, cols, dtype):
    a = a.astype(dtype)
    return jnp.pad(a, ((0, rows - a.shape[0]), (0, cols - a.shape[1])))


def critic_forward(x, params, *, tm=256, compute_dtype=jnp.float32):
    """x: (B, state_size) float32 -> (B, 1) float32."""
    (w1, b1), (w2, b2), (w3, b3), (w4, b4) = params
    B, S = x.shape
    S_pad = int(pl.cdiv(S, 128)) * 128
    B_pad = int(pl.cdiv(B, tm)) * tm
    n_tiles = B_pad // tm

    # Zero-pad feature dims to 128 and the batch to a multiple of TM.
    # NOTE: in a rollout/training loop the weight padding should be hoisted out
    # and done once (it is cheap, but not free per call).
    x_p = jnp.pad(x.astype(jnp.float32), ((0, B_pad - B), (0, S_pad - S)))
    w1_p = _pad2(w1, S_pad, _HID, compute_dtype)
    w2_p = _pad2(w2, _HID, _HID, compute_dtype)
    w3_p = _pad2(w3, _HID, _HID, compute_dtype)
    b1_p = _pad2(b1, 1, _HID, jnp.float32)
    b2_p = _pad2(b2, 1, _HID, jnp.float32)
    b3_p = _pad2(b3, 1, _HID, jnp.float32)
    w4_row = _pad2(w4.T, 1, _HID, jnp.float32)        # (1, 128)
    b4_s = b4.reshape(1, 1).astype(jnp.float32)       # scalar for SMEM

    resident = lambda i: (0, 0)   # constant block index -> weights stay in VMEM

    out = pl.pallas_call(
        _make_kernel(compute_dtype),
        grid=(n_tiles,),
        in_specs=[
            pl.BlockSpec((tm, S_pad), lambda i: (i, 0)),        # x tile (pipelined)
            pl.BlockSpec((S_pad, _HID), resident),              # w1
            pl.BlockSpec((1, _HID), resident),                  # b1
            pl.BlockSpec((_HID, _HID), resident),               # w2
            pl.BlockSpec((1, _HID), resident),                  # b2
            pl.BlockSpec((_HID, _HID), resident),               # w3
            pl.BlockSpec((1, _HID), resident),                  # b3
            pl.BlockSpec((1, _HID), resident),                  # w4 row
            pl.BlockSpec(memory_space=pltpu.MemorySpace.SMEM),  # b4 scalar
        ],
        out_specs=pl.BlockSpec((1, tm), lambda i: (i, 0)),      # lane-dense row
        out_shape=jax.ShapeDtypeStruct((n_tiles, tm), jnp.float32),
        compiler_params=pltpu.CompilerParams(
            dimension_semantics=("parallel",)),
    )(x_p, w1_p, b1_p, w2_p, b2_p, w3_p, b3_p, w4_row, b4_s)

    return out.reshape(B_pad)[:B].reshape(B, 1)


def init_linear(key, fan_in, fan_out):
    """Deterministic init mimicking PyTorch nn.Linear default (uniform +-1/sqrt(fan_in))."""
    kw, kb = jax.random.split(key)
    bound = 1.0 / np.sqrt(fan_in)
    w = jax.random.uniform(kw, (fan_in, fan_out), jnp.float32, -bound, bound)
    b = jax.random.uniform(kb, (1, fan_out), jnp.float32, -bound, bound)
    return w, b


def init_params(key, state_size):
    k1, k2, k3, k4 = jax.random.split(key, 4)
    return (
        init_linear(k1, state_size, 64),
        init_linear(k2, 64, 128),
        init_linear(k3, 128, 64),
        init_linear(k4, 64, 1),
    )


def critic_reference(x, params):
    (w1, b1), (w2, b2), (w3, b3), (w4, b4) = params
    h = jnp.maximum(x @ w1 + b1, 0.0)
    h = jnp.maximum(h @ w2 + b2, 0.0)
    h = jnp.maximum(h @ w3 + b3, 0.0)
    return h @ w4 + b4


if __name__ == "__main__":
    key = jax.random.PRNGKey(0)
    kx, kp = jax.random.split(key)

    batch = 8
    state_size = 32

    x = jax.random.normal(kx, (batch, state_size), dtype=jnp.float32)
    params = init_params(kp, state_size)

    # f32 operands by default; set compute_dtype=jnp.bfloat16 on v6e/v7x when
    # MXU-bound at large batch (accumulation stays f32).
    fwd = jax.jit(functools.partial(critic_forward, tm=256,
                                    compute_dtype=jnp.float32))
    out = fwd(x, params)
    out = jax.block_until_ready(out)

    ref = critic_reference(x, params)
    np.testing.assert_allclose(np.asarray(out), np.asarray(ref),
                               rtol=1e-5, atol=1e-5)
    assert out.shape == (batch, 1)

    print("KERNEL_OK")
</pallas_src>

<mosaic_0001>
module attributes {stable_mosaic.version = 11 : i64} {
  func.func @kernel(%arg0: i32, %arg1: memref<256x128xf32, #tpu.memory_space<vmem>>, %arg2: memref<128x128xf32, #tpu.memory_space<vmem>>, %arg3: memref<1x128xf32, #tpu.memory_space<vmem>>, %arg4: memref<128x128xf32, #tpu.memory_space<vmem>>, %arg5: memref<1x128xf32, #tpu.memory_space<vmem>>, %arg6: memref<128x128xf32, #tpu.memory_space<vmem>>, %arg7: memref<1x128xf32, #tpu.memory_space<vmem>>, %arg8: memref<1x128xf32, #tpu.memory_space<vmem>>, %arg9: memref<1x1xf32, #tpu.memory_space<smem>>, %arg10: memref<1x256xf32, #tpu.memory_space<vmem>>) attributes {dimension_semantics = [#tpu.dimension_semantics<parallel>], iteration_bounds = array<i64: 1>, scalar_prefetch = 0 : i64, scratch_operands = 0 : i64, tpu.core_type = #tpu.core_type<tc>, window_params = [{transform_indices = @transform_0, window_bounds = array<i64: 256, 128>}, {pipeline_mode = #tpu.pipeline_mode<synchronous>, transform_indices = @transform_1, window_bounds = array<i64: 128, 128>}, {pipeline_mode = #tpu.pipeline_mode<synchronous>, transform_indices = @transform_2, window_bounds = array<i64: 1, 128>}, {pipeline_mode = #tpu.pipeline_mode<synchronous>, transform_indices = @transform_3, window_bounds = array<i64: 128, 128>}, {pipeline_mode = #tpu.pipeline_mode<synchronous>, transform_indices = @transform_4, window_bounds = array<i64: 1, 128>}, {pipeline_mode = #tpu.pipeline_mode<synchronous>, transform_indices = @transform_5, window_bounds = array<i64: 128, 128>}, {pipeline_mode = #tpu.pipeline_mode<synchronous>, transform_indices = @transform_6, window_bounds = array<i64: 1, 128>}, {pipeline_mode = #tpu.pipeline_mode<synchronous>, transform_indices = @transform_7, window_bounds = array<i64: 1, 128>}, {transform_indices = @transform_8, window_bounds = array<i64: 1, 1>}, {transform_indices = @transform_9, window_bounds = array<i64: 1, 256>}]} {
    %c0 = arith.constant 0 : index
    %c0_0 = arith.constant 0 : index
    %0 = vector.load %arg1[%c0, %c0_0] : memref<256x128xf32, #tpu.memory_space<vmem>>, vector<256x128xf32>
    %c0_1 = arith.constant 0 : index
    %c0_2 = arith.constant 0 : index
    %1 = vector.load %arg2[%c0_1, %c0_2] : memref<128x128xf32, #tpu.memory_space<vmem>>, vector<128x128xf32>
    %cst = arith.constant dense<0.000000e+00> : vector<256x128xf32>
    %2 = tpu.matmul %0, %1, %cst {dimension_numbers = #tpu.dot_dimension_numbers<[1], [0], [0], [1], [0, 0, 1, 1], [], []>} : vector<256x128xf32>, vector<128x128xf32>, vector<256x128xf32> -> vector<256x128xf32>
    %c0_3 = arith.constant 0 : index
    %c0_4 = arith.constant 0 : index
    %3 = vector.load %arg3[%c0_3, %c0_4] : memref<1x128xf32, #tpu.memory_space<vmem>>, vector<1x128xf32>
    %4 = vector.broadcast %3 : vector<1x128xf32> to vector<256x128xf32>
    %5 = arith.addf %2, %4 : vector<256x128xf32>
    %cst_5 = arith.constant 0.000000e+00 : f32
    %6 = vector.broadcast %cst_5 : f32 to vector<256x128xf32>
    %7 = arith.maximumf %5, %6 : vector<256x128xf32>
    %c0_6 = arith.constant 0 : index
    %c0_7 = arith.constant 0 : index
    %8 = vector.load %arg4[%c0_6, %c0_7] : memref<128x128xf32, #tpu.memory_space<vmem>>, vector<128x128xf32>
    %cst_8 = arith.constant dense<0.000000e+00> : vector<256x128xf32>
    %9 = tpu.matmul %7, %8, %cst_8 {dimension_numbers = #tpu.dot_dimension_numbers<[1], [0], [0], [1], [0, 0, 1, 1], [], []>} : vector<256x128xf32>, vector<128x128xf32>, vector<256x128xf32> -> vector<256x128xf32>
    %c0_9 = arith.constant 0 : index
    %c0_10 = arith.constant 0 : index
    %10 = vector.load %arg5[%c0_9, %c0_10] : memref<1x128xf32, #tpu.memory_space<vmem>>, vector<1x128xf32>
    %11 = vector.broadcast %10 : vector<1x128xf32> to vector<256x128xf32>
    %12 = arith.addf %9, %11 : vector<256x128xf32>
    %cst_11 = arith.constant 0.000000e+00 : f32
    %13 = vector.broadcast %cst_11 : f32 to vector<256x128xf32>
    %14 = arith.maximumf %12, %13 : vector<256x128xf32>
    %c0_12 = arith.constant 0 : index
    %c0_13 = arith.constant 0 : index
    %15 = vector.load %arg6[%c0_12, %c0_13] : memref<128x128xf32, #tpu.memory_space<vmem>>, vector<128x128xf32>
    %cst_14 = arith.constant dense<0.000000e+00> : vector<256x128xf32>
    %16 = tpu.matmul %14, %15, %cst_14 {dimension_numbers = #tpu.dot_dimension_numbers<[1], [0], [0], [1], [0, 0, 1, 1], [], []>} : vector<256x128xf32>, vector<128x128xf32>, vector<256x128xf32> -> vector<256x128xf32>
    %c0_15 = arith.constant 0 : index
    %c0_16 = arith.constant 0 : index
    %17 = vector.load %arg7[%c0_15, %c0_16] : memref<1x128xf32, #tpu.memory_space<vmem>>, vector<1x128xf32>
    %18 = vector.broadcast %17 : vector<1x128xf32> to vector<256x128xf32>
    %19 = arith.addf %16, %18 : vector<256x128xf32>
    %cst_17 = arith.constant 0.000000e+00 : f32
    %20 = vector.broadcast %cst_17 : f32 to vector<256x128xf32>
    %21 = arith.maximumf %19, %20 : vector<256x128xf32>
    %c0_18 = arith.constant 0 : index
    %c0_19 = arith.constant 0 : index
    %22 = vector.load %arg8[%c0_18, %c0_19] : memref<1x128xf32, #tpu.memory_space<vmem>>, vector<1x128xf32>
    %cst_20 = arith.constant dense<0.000000e+00> : vector<1x256xf32>
    %23 = tpu.matmul %22, %21, %cst_20 {dimension_numbers = #tpu.dot_dimension_numbers<[1], [1], [0], [0], [0, 0, 1, 0], [], []>} : vector<1x128xf32>, vector<256x128xf32>, vector<1x256xf32> -> vector<1x256xf32>
    %c0_21 = arith.constant 0 : index
    %c0_22 = arith.constant 0 : index
    %24 = memref.load %arg9[%c0_21, %c0_22] : memref<1x1xf32, #tpu.memory_space<smem>>
    %25 = vector.broadcast %24 : f32 to vector<1x256xf32>
    %26 = arith.addf %23, %25 : vector<1x256xf32>
    %c0_23 = arith.constant 0 : index
    %c0_24 = arith.constant 0 : index
    %27 = vector.load %arg10[%c0_23, %c0_24] : memref<1x256xf32, #tpu.memory_space<vmem>>, vector<1x256xf32>
    tpu.vector_store %arg10[%c0_23, %c0_24], %26 {strides = array<i32>} : memref<1x256xf32, #tpu.memory_space<vmem>>, vector<1x256xf32>,
    return
  }
  func.func @transform_0(%arg0: i32) -> (i32, i32) {
    %c0_i32 = arith.constant 0 : i32
    %c0_i32_0 = arith.constant 0 : i32
    return %arg0, %c0_i32 : i32, i32
  }
  func.func @transform_1(%arg0: i32) -> (i32, i32) {
    %c0_i32 = arith.constant 0 : i32
    %c0_i32_0 = arith.constant 0 : i32
    %c0_i32_1 = arith.constant 0 : i32
    return %c0_i32, %c0_i32_0 : i32, i32
  }
  func.func @transform_2(%arg0: i32) -> (i32, i32) {
    %c0_i32 = arith.constant 0 : i32
    %c0_i32_0 = arith.constant 0 : i32
    %c0_i32_1 = arith.constant 0 : i32
    return %c0_i32, %c0_i32_0 : i32, i32
  }
  func.func @transform_3(%arg0: i32) -> (i32, i32) {
    %c0_i32 = arith.constant 0 : i32
    %c0_i32_0 = arith.constant 0 : i32
    %c0_i32_1 = arith.constant 0 : i32
    return %c0_i32, %c0_i32_0 : i32, i32
  }
  func.func @transform_4(%arg0: i32) -> (i32, i32) {
    %c0_i32 = arith.constant 0 : i32
    %c0_i32_0 = arith.constant 0 : i32
    %c0_i32_1 = arith.constant 0 : i32
    return %c0_i32, %c0_i32_0 : i32, i32
  }
  func.func @transform_5(%arg0: i32) -> (i32, i32) {
    %c0_i32 = arith.constant 0 : i32
    %c0_i32_0 = arith.constant 0 : i32
    %c0_i32_1 = arith.constant 0 : i32
    return %c0_i32, %c0_i32_0 : i32, i32
  }
  func.func @transform_6(%arg0: i32) -> (i32, i32) {
    %c0_i32 = arith.constant 0 : i32
    %c0_i32_0 = arith.constant 0 : i32
    %c0_i32_1 = arith.constant 0 : i32
    return %c0_i32, %c0_i32_0 : i32, i32
  }
  func.func @transform_7(%arg0: i32) -> (i32, i32) {
    %c0_i32 = arith.constant 0 : i32
    %c0_i32_0 = arith.constant 0 : i32
    %c0_i32_1 = arith.constant 0 : i32
    return %c0_i32, %c0_i32_0 : i32, i32
  }
  func.func @transform_8(%arg0: i32) -> (i32, i32) {
    %c0_i32 = arith.constant 0 : i32
    %c0_i32_0 = arith.constant 0 : i32
    %c0_i32_1 = arith.constant 0 : i32
    return %c0_i32, %c0_i32_0 : i32, i32
  }
  func.func @transform_9(%arg0: i32) -> (i32, i32) {
    %c0_i32 = arith.constant 0 : i32
    %c0_i32_0 = arith.constant 0 : i32
    return %arg0, %c0_i32 : i32, i32
  }
}

</mosaic_0001>

<bundles_post_ra>
// kernel: critic_forward.1
= control target key start
LH: loop header
LB: loop body
LE: loop exit
PB: predicated region body
PF: predicated region fallthrough
CT: control target
= control target key end

     0   :  { %s1929_s1 = inlined_call_operand.vmem [shape: f32[128,128], index: 1, kind: input, shape index: {}]   ;;  %s1930_s0 = inlined_call_operand.vmem [shape: f32[256,128], index: 0, kind: input, shape index: {}]   ;;  %s1931_s3 = inlined_call_operand.vmem [shape: f32[128,128], index: 3, kind: input, shape index: {}]   ;;  %s1932_s5 = inlined_call_operand.vmem [shape: f32[128,128], index: 5, kind: input, shape index: {}]   ;;  %s1933_s2 = inlined_call_operand.vmem [shape: f32[1,128], index: 2, kind: input, shape index: {}]   ;;  %s1934_s4 = inlined_call_operand.vmem [shape: f32[1,128], index: 4, kind: input, shape index: {}]   ;;  %s1935_s7 = inlined_call_operand.vmem [shape: f32[1,128], index: 7, kind: input, shape index: {}]   ;;  %s1936_s6 = inlined_call_operand.vmem [shape: f32[1,128], index: 6, kind: input, shape index: {}]   ;;  %s1937_s8 = inlined_call_operand.<no memory space> [shape: f32[1,1], index: 8, kind: input, shape index: {}]   ;;  %s1938_s9 = inlined_call_operand.vmem [shape: f32[1,256], index: 9, kind: output, shape index: {}]  }
   0x1   :  { %v80_v0 = vld [vmem:[%s1929_s1 + $0x78] sm:$0xff]  ;;  %v79_v1 = vld [vmem:[%s1929_s1 + $0x70] sm:$0xff]  ;;  %v78_v2 = vld [vmem:[%s1929_s1 + $0x68] sm:$0xff] }
   0x2   :  { %1187 = vmatprep.subr.mxu0 %v80_v0  ;;  %1427 = vmatprep.subr.mxu1 %v80_v0  ;;  %v77_v3 = vld [vmem:[%s1929_s1 + $0x60] sm:$0xff]  ;;  %v76_v5 = vld [vmem:[%s1929_s1 + $0x58] sm:$0xff]  ;;  %v75_v6 = vld [vmem:[%s1929_s1 + $0x50] sm:$0xff] }
   0x3   :  { %1188 = vmatpush3.msra.mxu0 %v80_v0  ;;  %1443 = vmatpush3.msra.mxu1 %v80_v0  ;;  %v33_v4 = vld [vmem:[%s1930_s0] sm:$0xff]  ;;  %v74_v7 = vld [vmem:[%s1929_s1 + $0x48] sm:$0xff]  ;;  %v72_v9 = vld [vmem:[%s1929_s1 + $0x38] sm:$0xff] }
   0x4   :  { %1189 = vmatprep.subr.mxu0 %v79_v1  ;;  %1428 = vmatprep.subr.mxu1 %v79_v1  ;;  %v73_v8 = vld [vmem:[%s1929_s1 + $0x40] sm:$0xff]  ;;  %v71_v10 = vld [vmem:[%s1929_s1 + $0x30] sm:$0xff]  ;;  %v70_v11 = vld [vmem:[%s1929_s1 + $0x28] sm:$0xff] }
   0x5   :  { %1190 = vmatpush3.msra.mxu0 %v79_v1  ;;  %1444 = vmatpush3.msra.mxu1 %v79_v1  ;;  %v69_v12 = vld [vmem:[%s1929_s1 + $0x20] sm:$0xff]  ;;  %v68_v13 = vld [vmem:[%s1929_s1 + $0x18] sm:$0xff]  ;;  %v67_v14 = vld [vmem:[%s1929_s1 + $0x10] sm:$0xff] }
   0x6   :  { %1191 = vmatprep.subr.mxu0 %v78_v2  ;;  %1429 = vmatprep.subr.mxu1 %v78_v2  ;;  %v66_v15 = vld [vmem:[%s1929_s1 + $0x8] sm:$0xff]  ;;  %v65_v16 = vld [vmem:[%s1929_s1] sm:$0xff]  ;;  %v35_v18 = vld [vmem:[%s1930_s0 + $0x10] sm:$0xff] }
   0x7   :  { %1192 = vmatpush3.msra.mxu0 %v78_v2  ;;  %1219 = vmatprep.mubr.f32.mxu0 %v33_v4  ;;  %v34_v17 = vld [vmem:[%s1930_s0 + $0x8] sm:$0xff]  ;;  %v49_v19 = vld [vmem:[%s1930_s0 + $0x80] sm:$0xff]  ;;  %v360_v21 = vld [vmem:[%s1931_s3 + $0x78] sm:$0xff] }
   0x8   :  { %1193 = vmatprep.subr.mxu0 %v77_v3  ;;  %1445 = vmatpush3.msra.mxu1 %v78_v2  ;;  %v50_v20 = vld [vmem:[%s1930_s0 + $0x88] sm:$0xff]  ;;  %v51_v22 = vld [vmem:[%s1930_s0 + $0x90] sm:$0xff]  ;;  %v36_v23 = vld [vmem:[%s1930_s0 + $0x18] sm:$0xff] }
   0x9   :  { %1194 = vmatpush3.msra.mxu0 %v77_v3  ;;  %1430 = vmatprep.subr.mxu1 %v77_v3  ;;  %v359_v24 = vld [vmem:[%s1931_s3 + $0x70] sm:$0xff]  ;;  %v37_v25 = vld [vmem:[%s1930_s0 + $0x20] sm:$0xff]  ;;  %v52_v26 = vld [vmem:[%s1930_s0 + $0x98] sm:$0xff] }
   0xa   :  { %1195 = vmatprep.subr.mxu0 %v76_v5  ;;  %1446 = vmatpush3.msra.mxu1 %v77_v3  ;;  %v358_v27 = vld [vmem:[%s1931_s3 + $0x68] sm:$0xff]  ;;  %v53_v28 = vld [vmem:[%s1930_s0 + $0xa0] sm:$0xff]  ;;  %v39_v31 = vld [vmem:[%s1930_s0 + $0x30] sm:$0xff] }
   0xb   :  { %1196 = vmatpush3.msra.mxu0 %v76_v5  ;;  %1431 = vmatprep.subr.mxu1 %v76_v5  ;;  %v38_v29 = vld [vmem:[%s1930_s0 + $0x28] sm:$0xff]  ;;  %v357_v30 = vld [vmem:[%s1931_s3 + $0x60] sm:$0xff]  ;;  %v356_v33 = vld [vmem:[%s1931_s3 + $0x58] sm:$0xff] }
   0xc   :  { %1197 = vmatprep.subr.mxu0 %v75_v6  ;;  %1447 = vmatpush3.msra.mxu1 %v76_v5  ;;  %v54_v32 = vld [vmem:[%s1930_s0 + $0xa8] sm:$0xff]  ;;  %v55_v34 = vld [vmem:[%s1930_s0 + $0xb0] sm:$0xff]  ;;  %v40_v35 = vld [vmem:[%s1930_s0 + $0x38] sm:$0xff] }
   0xd   :  { %1198 = vmatpush3.msra.mxu0 %v75_v6  ;;  %1432 = vmatprep.subr.mxu1 %v75_v6  ;;  %v355_v36 = vld [vmem:[%s1931_s3 + $0x50] sm:$0xff]  ;;  %v41_v37 = vld [vmem:[%s1930_s0 + $0x40] sm:$0xff]  ;;  %v56_v38 = vld [vmem:[%s1930_s0 + $0xb8] sm:$0xff] }
   0xe   :  { %1199 = vmatprep.subr.mxu0 %v74_v7  ;;  %1448 = vmatpush3.msra.mxu1 %v75_v6  ;;  %v354_v39 = vld [vmem:[%s1931_s3 + $0x48] sm:$0xff]  ;;  %v57_v40 = vld [vmem:[%s1930_s0 + $0xc0] sm:$0xff]  ;;  %v43_v43 = vld [vmem:[%s1930_s0 + $0x50] sm:$0xff] }
   0xf   :  { %1200 = vmatpush3.msra.mxu0 %v74_v7  ;;  %1433 = vmatprep.subr.mxu1 %v74_v7  ;;  %v42_v41 = vld [vmem:[%s1930_s0 + $0x48] sm:$0xff]  ;;  %v353_v42 = vld [vmem:[%s1931_s3 + $0x40] sm:$0xff]  ;;  %v352_v45 = vld [vmem:[%s1931_s3 + $0x38] sm:$0xff] }
  0x10   :  { %1201 = vmatprep.subr.mxu0 %v73_v8  ;;  %1449 = vmatpush3.msra.mxu1 %v74_v7  ;;  %v58_v44 = vld [vmem:[%s1930_s0 + $0xc8] sm:$0xff]  ;;  %v59_v46 = vld [vmem:[%s1930_s0 + $0xd0] sm:$0xff]  ;;  %v44_v47 = vld [vmem:[%s1930_s0 + $0x58] sm:$0xff] }
  0x11   :  { %1202 = vmatpush3.msra.mxu0 %v73_v8  ;;  %1434 = vmatprep.subr.mxu1 %v73_v8  ;;  %v351_v48 = vld [vmem:[%s1931_s3 + $0x30] sm:$0xff]  ;;  %v45_v49 = vld [vmem:[%s1930_s0 + $0x60] sm:$0xff]  ;;  %v60_v50 = vld [vmem:[%s1930_s0 + $0xd8] sm:$0xff] }
  0x12   :  { %1203 = vmatprep.subr.mxu0 %v72_v9  ;;  %1450 = vmatpush3.msra.mxu1 %v73_v8  ;;  %v350_v51 = vld [vmem:[%s1931_s3 + $0x28] sm:$0xff]  ;;  %v61_v52 = vld [vmem:[%s1930_s0 + $0xe0] sm:$0xff]  ;;  %v47_v55 = vld [vmem:[%s1930_s0 + $0x70] sm:$0xff] }
  0x13   :  { %1204 = vmatpush3.msra.mxu0 %v72_v9  ;;  %1435 = vmatprep.subr.mxu1 %v72_v9  ;;  %v46_v53 = vld [vmem:[%s1930_s0 + $0x68] sm:$0xff]  ;;  %v349_v54 = vld [vmem:[%s1931_s3 + $0x20] sm:$0xff]  ;;  %v63_v57 = vld [vmem:[%s1930_s0 + $0xf0] sm:$0xff] }
  0x14   :  { %1205 = vmatprep.subr.mxu0 %v71_v10  ;;  %1451 = vmatpush3.msra.mxu1 %v72_v9  ;;  %v62_v56 = vld [vmem:[%s1930_s0 + $0xe8] sm:$0xff]  ;;  %v48_v58 = vld [vmem:[%s1930_s0 + $0x78] sm:$0xff]  ;;  %v347_v61 = vld [vmem:[%s1931_s3 + $0x10] sm:$0xff] }
  0x15   :  { %1206 = vmatpush3.msra.mxu0 %v71_v10  ;;  %1436 = vmatprep.subr.mxu1 %v71_v10  ;;  %v64_v59 = vld [vmem:[%s1930_s0 + $0xf8] sm:$0xff]  ;;  %v346_v62 = vld [vmem:[%s1931_s3 + $0x8] sm:$0xff]  ;;  %v345_v63 = vld [vmem:[%s1931_s3] sm:$0xff] }
  0x16   :  { %1207 = vmatprep.subr.mxu0 %v70_v11  ;;  %1452 = vmatpush3.msra.mxu1 %v71_v10  ;;  %v348_v60 = vld [vmem:[%s1931_s3 + $0x18] sm:$0xff]  ;;  %v639_v1 = vld [vmem:[%s1932_s5 + $0x70] sm:$0xff]  ;;  %v638_v2 = vld [vmem:[%s1932_s5 + $0x68] sm:$0xff] }
  0x17   :  { %1208 = vmatpush3.msra.mxu0 %v70_v11  ;;  %1437 = vmatprep.subr.mxu1 %v70_v11  ;;  %v640_v0 = vld [vmem:[%s1932_s5 + $0x78] sm:$0xff]  ;;  %v637_v3 = vld [vmem:[%s1932_s5 + $0x60] sm:$0xff]  ;;  %v635_v5 = vld [vmem:[%s1932_s5 + $0x50] sm:$0xff] }
  0x18   :  { %1209 = vmatprep.subr.mxu0 %v69_v12  ;;  %1453 = vmatpush3.msra.mxu1 %v70_v11  ;;  %v636_v4 = vld [vmem:[%s1932_s5 + $0x58] sm:$0xff]  ;;  %v634_v6 = vld [vmem:[%s1932_s5 + $0x48] sm:$0xff]  ;;  %v633_v7 = vld [vmem:[%s1932_s5 + $0x40] sm:$0xff] }
  0x19   :  { %1210 = vmatpush3.msra.mxu0 %v69_v12  ;;  %1438 = vmatprep.subr.mxu1 %v69_v12  ;;  %v632_v8 = vld [vmem:[%s1932_s5 + $0x38] sm:$0xff]  ;;  %v631_v9 = vld [vmem:[%s1932_s5 + $0x30] sm:$0xff]  ;;  %v630_v10 = vld [vmem:[%s1932_s5 + $0x28] sm:$0xff] }
  0x1a   :  { %1211 = vmatprep.subr.mxu0 %v68_v13  ;;  %1454 = vmatpush3.msra.mxu1 %v69_v12  ;;  %v629_v11 = vld [vmem:[%s1932_s5 + $0x20] sm:$0xff] }
  0x1b   :  { %1212 = vmatpush3.msra.mxu0 %v68_v13  ;;  %1439 = vmatprep.subr.mxu1 %v68_v13  ;;  %v1742_v12 = vld [vmem:[%s1933_s2] ss:$0 sm:$0xff] }
  0x1c   :  { %1213 = vmatprep.subr.mxu0 %v67_v14  ;;  %1455 = vmatpush3.msra.mxu1 %v68_v13 }
  0x1d   :  { %1214 = vmatpush3.msra.mxu0 %v67_v14  ;;  %1440 = vmatprep.subr.mxu1 %v67_v14 }
  0x1e   :  { %1215 = vmatprep.subr.mxu0 %v66_v15  ;;  %1456 = vmatpush3.msra.mxu1 %v67_v14 }
  0x1f   :  { %1216 = vmatpush3.msra.mxu0 %v66_v15  ;;  %1441 = vmatprep.subr.mxu1 %v66_v15 }
  0x20   :  { %1217 = vmatprep.subr.mxu0 %v65_v16  ;;  %1457 = vmatpush3.msra.mxu1 %v66_v15 }
  0x21   :  { %1218 = vmatpush3.msra.mxu0 %v65_v16  ;;  %1442 = vmatprep.subr.mxu1 %v65_v16 }
  0x22   :  { %1220 = vmatmul.mubr.f32.vlgmr.msra.gmra.mxu0 %v34_v17  ;;  %1458 = vmatpush3.msra.mxu1 %v65_v16 }
  0x23   :  { %1222 = vmatprep.mubr.f32.mxu0 %v35_v18  ;;  %1243 = vmatprep.mubr.f32.mxu1 %v49_v19 }
  0x24   :  { %1244 = vmatmul.mubr.f32.vlgmr.msra.gmra.mxu1 %v50_v20  ;;  %1267 = vmatprep.subr.mxu1 %v360_v21 }
  0x25   :  { %1246 = vmatprep.mubr.f32.mxu1 %v51_v22  ;;  %1268 = vmatpush3.msra.mxu1 %v360_v21 }
  0x26   :  { %1223 = vmatmul.mubr.f32.gmra.mxu0 %v36_v23  ;;  %1269 = vmatprep.subr.mxu1 %v359_v24 }
  0x27   :  { %1225 = vmatprep.mubr.f32.mxu0 %v37_v25  ;;  %1270 = vmatpush3.msra.mxu1 %v359_v24 }
  0x28   :  { %1247 = vmatmul.mubr.f32.gmra.mxu1 %v52_v26  ;;  %1271 = vmatprep.subr.mxu1 %v358_v27 }
  0x29   :  { %1249 = vmatprep.mubr.f32.mxu1 %v53_v28  ;;  %1272 = vmatpush3.msra.mxu1 %v358_v27 }
  0x2a   :  { %1226 = vmatmul.mubr.f32.gmra.mxu0 %v38_v29  ;;  %1273 = vmatprep.subr.mxu1 %v357_v30 }
  0x2b   :  { %1228 = vmatprep.mubr.f32.mxu0 %v39_v31  ;;  %1274 = vmatpush3.msra.mxu1 %v357_v30 }
  0x2c   :  { %1250 = vmatmul.mubr.f32.gmra.mxu1 %v54_v32  ;;  %1275 = vmatprep.subr.mxu1 %v356_v33 }
  0x2d   :  { %1252 = vmatprep.mubr.f32.mxu1 %v55_v34  ;;  %1276 = vmatpush3.msra.mxu1 %v356_v33 }
  0x2e   :  { %1229 = vmatmul.mubr.f32.gmra.mxu0 %v40_v35  ;;  %1277 = vmatprep.subr.mxu1 %v355_v36 }
  0x2f   :  { %1231 = vmatprep.mubr.f32.mxu0 %v41_v37  ;;  %1278 = vmatpush3.msra.mxu1 %v355_v36 }
  0x30   :  { %1253 = vmatmul.mubr.f32.gmra.mxu1 %v56_v38  ;;  %1279 = vmatprep.subr.mxu1 %v354_v39 }
  0x31   :  { %1255 = vmatprep.mubr.f32.mxu1 %v57_v40  ;;  %1280 = vmatpush3.msra.mxu1 %v354_v39 }
  0x32   :  { %1232 = vmatmul.mubr.f32.gmra.mxu0 %v42_v41  ;;  %1281 = vmatprep.subr.mxu1 %v353_v42 }
  0x33   :  { %1234 = vmatprep.mubr.f32.mxu0 %v43_v43  ;;  %1282 = vmatpush3.msra.mxu1 %v353_v42 }
  0x34   :  { %1256 = vmatmul.mubr.f32.gmra.mxu1 %v58_v44  ;;  %1283 = vmatprep.subr.mxu1 %v352_v45 }
  0x35   :  { %1258 = vmatprep.mubr.f32.mxu1 %v59_v46  ;;  %1284 = vmatpush3.msra.mxu1 %v352_v45 }
  0x36   :  { %1235 = vmatmul.mubr.f32.gmra.mxu0 %v44_v47  ;;  %1285 = vmatprep.subr.mxu1 %v351_v48 }
  0x37   :  { %1237 = vmatprep.mubr.f32.mxu0 %v45_v49  ;;  %1286 = vmatpush3.msra.mxu1 %v351_v48 }
  0x38   :  { %1259 = vmatmul.mubr.f32.gmra.mxu1 %v60_v50  ;;  %1287 = vmatprep.subr.mxu1 %v350_v51 }
  0x39   :  { %1261 = vmatprep.mubr.f32.mxu1 %v61_v52  ;;  %1288 = vmatpush3.msra.mxu1 %v350_v51 }
  0x3a   :  { %1238 = vmatmul.mubr.f32.gmra.mxu0 %v46_v53  ;;  %1289 = vmatprep.subr.mxu1 %v349_v54 }
  0x3b   :  { %1240 = vmatprep.mubr.f32.mxu0 %v47_v55  ;;  %1290 = vmatpush3.msra.mxu1 %v349_v54 }
  0x3c   :  { %1262 = vmatmul.mubr.f32.gmra.mxu1 %v62_v56  ;;  %1291 = vmatprep.subr.mxu1 %v348_v60 }
  0x3d   :  { %1264 = vmatprep.mubr.f32.mxu1 %v63_v57  ;;  %1292 = vmatpush3.msra.mxu1 %v348_v60 }
  0x3e   :  { %1241 = vmatmul.mubr.f32.gmra.mxu0 %v48_v58  ;;  %1293 = vmatprep.subr.mxu1 %v347_v61 }
  0x3f   :  { %1294 = vmatpush3.msra.mxu1 %v347_v61  ;;  %1347 = vmatprep.subr.mxu0 %v640_v0 }
  0x40   :  { %1265 = vmatmul.mubr.f32.gmra.mxu1 %v64_v59  ;;  %1295 = vmatprep.subr.mxu1 %v346_v62 }
  0x41   :  { %1296 = vmatpush3.msra.mxu1 %v346_v62  ;;  %1348 = vmatpush3.msra.mxu0 %v640_v0 }
  0x42   :  { %1297 = vmatprep.subr.mxu1 %v345_v63  ;;  %1349 = vmatprep.subr.mxu0 %v639_v1 }
  0x43   :  { %1298 = vmatpush3.msra.mxu1 %v345_v63  ;;  %1350 = vmatpush3.msra.mxu0 %v639_v1 }
  0x44   :  { %1351 = vmatprep.subr.mxu0 %v638_v2 }
  0x45   :  { %1352 = vmatpush3.msra.mxu0 %v638_v2 }
  0x46   :  { %1353 = vmatprep.subr.mxu0 %v637_v3 }
  0x47   :  { %1354 = vmatpush3.msra.mxu0 %v637_v3 }
  0x48   :  { %1355 = vmatprep.subr.mxu0 %v636_v4 }
  0x49   :  { %1356 = vmatpush3.msra.mxu0 %v636_v4 }
  0x4a   :  { %1357 = vmatprep.subr.mxu0 %v635_v5 }
  0x4b   :  { %1358 = vmatpush3.msra.mxu0 %v635_v5 }
  0x4c   :  { %1359 = vmatprep.subr.mxu0 %v634_v6 }
  0x4d   :  { %1360 = vmatpush3.msra.mxu0 %v634_v6 }
  0x4e   :  { %1361 = vmatprep.subr.mxu0 %v633_v7 }
  0x4f   :  { %1362 = vmatpush3.msra.mxu0 %v633_v7 }
  0x50   :  { %1363 = vmatprep.subr.mxu0 %v632_v8 }
  0x51   :  { %1364 = vmatpush3.msra.mxu0 %v632_v8 }
  0x52   :  { %1365 = vmatprep.subr.mxu0 %v631_v9 }
  0x53   :  { %1366 = vmatpush3.msra.mxu0 %v631_v9 }
  0x54   :  { %1367 = vmatprep.subr.mxu0 %v630_v10 }
  0x55   :  { %1368 = vmatpush3.msra.mxu0 %v630_v10 }
  0x56   :  { %1369 = vmatprep.subr.mxu0 %v629_v11 }
  0x57   :  { %1370 = vmatpush3.msra.mxu0 %v629_v11 }
  0xe2   :  { %v1221_v13 = vpop.f32.mrf.mxu0 }
  0xe3   :  { %v160_v14 = vadd.f32 %v1221_v13, %v1742_v12 }
  0xe4   :  { %v154_v15 = vpop.f32.mrf.mxu0  ;;  %v1745_v16 = vpop.f32.mrf.mxu1 }
  0xe5   :  { %v155_v17 = vadd.f32 %v1742_v12, %v154_v15  ;;  %v314_v21 = vmax.f32 %v160_v14, 0.0  ;;  %v240_v10 = vadd.f32 %v1745_v16, %v1742_v12 }
  0xe6   :  { %v1224_v18 = vpop.f32.mrf.mxu0  ;;  %v234_v19 = vpop.f32.mrf.mxu1 }
  0xe7   :  { %v313_v20 = vmax.f32 %v155_v17, 0.0  ;;  %v170_v22 = vadd.f32 %v1224_v18, %v1742_v12  ;;  %v235_v0 = vadd.f32 %v1742_v12, %v234_v19  ;;  %v330_v15 = vmax.f32 %v240_v10, 0.0 }
  0xe8   :  { %v164_v23 = vpop.f32.mrf.mxu0  ;;  %v1749_v24 = vpop.f32.mrf.mxu1 }
  0xe9   :  { %v165_v25 = vadd.f32 %v1742_v12, %v164_v23  ;;  %1299 = vmatprep.mubr.f32.mxu1 %v313_v20  ;;  %v316_v29 = vmax.f32 %v170_v22, 0.0  ;;  %v329_v7 = vmax.f32 %v235_v0, 0.0  ;;  %v250_v17 = vadd.f32 %v1749_v24, %v1742_v12 }
  0xea   :  { %v1227_v26 = vpop.f32.mrf.mxu0  ;;  %1300 = vmatmul.mubr.f32.vlgmr.msra.gmra.mxu1 %v314_v21  ;;  %v244_v27 = vpop.f32.mrf.mxu1 }
  0xeb   :  { %v315_v28 = vmax.f32 %v165_v25, 0.0  ;;  %v180_v30 = vadd.f32 %v1227_v26, %v1742_v12  ;;  %v245_v8 = vadd.f32 %v1742_v12, %v244_v27  ;;  %v332_v21 = vmax.f32 %v250_v17, 0.0 }
  0xec   :  { %v174_v31 = vpop.f32.mrf.mxu0  ;;  %v1753_v32 = vpop.f32.mrf.mxu1 }
  0xed   :  { %v175_v33 = vadd.f32 %v1742_v12, %v174_v31  ;;  %1302 = vmatprep.mubr.f32.mxu1 %v315_v28  ;;  %v318_v36 = vmax.f32 %v180_v30, 0.0  ;;  %v331_v13 = vmax.f32 %v245_v8, 0.0  ;;  %v260_v16 = vadd.f32 %v1753_v32, %v1742_v12 }
  0xee   :  { %v1230_v34 = vpop.f32.mrf.mxu0  ;;  %1303 = vmatmul.mubr.f32.gmra.mxu1 %v316_v29  ;;  %v254_v39 = vpop.f32.mrf.mxu1 }
  0xef   :  { %v317_v35 = vmax.f32 %v175_v33, 0.0  ;;  %v190_v37 = vadd.f32 %v1230_v34, %v1742_v12  ;;  %v255_v14 = vadd.f32 %v1742_v12, %v254_v39  ;;  %v334_v26 = vmax.f32 %v260_v16, 0.0 }
  0xf0   :  { %v184_v38 = vpop.f32.mrf.mxu0  ;;  %v1254_v46 = vpop.f32.mrf.mxu1 }
  0xf1   :  { %v185_v40 = vadd.f32 %v1742_v12, %v184_v38  ;;  %1305 = vmatprep.mubr.f32.mxu1 %v317_v35  ;;  %v320_v43 = vmax.f32 %v190_v37, 0.0  ;;  %v333_v19 = vmax.f32 %v255_v14, 0.0  ;;  %v270_v27 = vadd.f32 %v1254_v46, %v1742_v12  ;;  %v628_v46 = vld [vmem:[%s1932_s5 + $0x18] sm:$0xff] }
  0xf2   :  { %v1233_v41 = vpop.f32.mrf.mxu0  ;;  %1306 = vmatmul.mubr.f32.gmra.mxu1 %v318_v36  ;;  %v264_v53 = vpop.f32.mrf.mxu1  ;;  %1371 = vmatprep.subr.mxu0 %v628_v46 }
  0xf3   :  { %v319_v42 = vmax.f32 %v185_v40, 0.0  ;;  %v200_v44 = vadd.f32 %v1233_v41, %v1742_v12  ;;  %v265_v20 = vadd.f32 %v1742_v12, %v264_v53  ;;  %v336_v30 = vmax.f32 %v270_v27, 0.0  ;;  %1372 = vmatpush3.msra.mxu0 %v628_v46 }
  0xf4   :  { %v194_v45 = vpop.f32.mrf.mxu0  ;;  %v1257_v60 = vpop.f32.mrf.mxu1 }
  0xf5   :  { %v195_v47 = vadd.f32 %v1742_v12, %v194_v45  ;;  %1308 = vmatprep.mubr.f32.mxu1 %v319_v42  ;;  %v322_v50 = vmax.f32 %v200_v44, 0.0  ;;  %v335_v23 = vmax.f32 %v265_v20, 0.0  ;;  %v280_v31 = vadd.f32 %v1257_v60, %v1742_v12 }
  0xf6   :  { %v1236_v48 = vpop.f32.mrf.mxu0  ;;  %1309 = vmatmul.mubr.f32.gmra.mxu1 %v320_v43  ;;  %v274_v4 = vpop.f32.mrf.mxu1 }
  0xf7   :  { %v321_v49 = vmax.f32 %v195_v47, 0.0  ;;  %v210_v51 = vadd.f32 %v1236_v48, %v1742_v12  ;;  %v275_v25 = vadd.f32 %v1742_v12, %v274_v4  ;;  %v338_v35 = vmax.f32 %v280_v31, 0.0  ;;  %v627_v47 = vld [vmem:[%s1932_s5 + $0x10] sm:$0xff]  ;;  %v625_v48 = vld [vmem:[%s1932_s5] sm:$0xff] }
  0xf8   :  { %v204_v52 = vpop.f32.mrf.mxu0  ;;  %v1260_v11 = vpop.f32.mrf.mxu1  ;;  %1373 = vmatprep.subr.mxu0 %v627_v47 }
  0xf9   :  { %v205_v54 = vadd.f32 %v1742_v12, %v204_v52  ;;  %1311 = vmatprep.mubr.f32.mxu1 %v321_v49  ;;  %v324_v57 = vmax.f32 %v210_v51, 0.0  ;;  %v337_v28 = vmax.f32 %v275_v25, 0.0  ;;  %v290_v36 = vadd.f32 %v1260_v11, %v1742_v12  ;;  %1374 = vmatpush3.msra.mxu0 %v627_v47  ;;  %v1800_v49 = vld [vmem:[%s1934_s4] ss:$0 sm:$0xff] }
  0xfa   :  { %v1239_v55 = vpop.f32.mrf.mxu0  ;;  %1312 = vmatmul.mubr.f32.gmra.mxu1 %v322_v50  ;;  %v284_v18 = vpop.f32.mrf.mxu1 }
  0xfb   :  { %v323_v56 = vmax.f32 %v205_v54, 0.0  ;;  %v220_v58 = vadd.f32 %v1239_v55, %v1742_v12  ;;  %v285_v29 = vadd.f32 %v1742_v12, %v284_v18  ;;  %v340_v40 = vmax.f32 %v290_v36, 0.0 }
  0xfc   :  { %v214_v59 = vpop.f32.mrf.mxu0  ;;  %v1263_v22 = vpop.f32.mrf.mxu1 }
  0xfd   :  { %v215_v61 = vadd.f32 %v1742_v12, %v214_v59  ;;  %1314 = vmatprep.mubr.f32.mxu1 %v323_v56  ;;  %v326_v1 = vmax.f32 %v220_v58, 0.0  ;;  %v339_v32 = vmax.f32 %v285_v29, 0.0  ;;  %v300_v41 = vadd.f32 %v1263_v22, %v1742_v12 }
  0xfe   :  { %v1242_v62 = vpop.f32.mrf.mxu0  ;;  %1315 = vmatmul.mubr.f32.gmra.mxu1 %v324_v57  ;;  %v294_v24 = vpop.f32.mrf.mxu1 }
  0xff   :  { %v325_v63 = vmax.f32 %v215_v61, 0.0  ;;  %v230_v2 = vadd.f32 %v1242_v62, %v1742_v12  ;;  %v295_v34 = vadd.f32 %v1742_v12, %v294_v24  ;;  %v342_v43 = vmax.f32 %v300_v41, 0.0 }
 0x100   :  { %v224_v3 = vpop.f32.mrf.mxu0  ;;  %v1266_v33 = vpop.f32.mrf.mxu1 }
 0x101   :  { %v225_v5 = vadd.f32 %v1742_v12, %v224_v3  ;;  %1317 = vmatprep.mubr.f32.mxu1 %v325_v63  ;;  %v328_v9 = vmax.f32 %v230_v2, 0.0  ;;  %v341_v38 = vmax.f32 %v295_v34, 0.0  ;;  %v310_v44 = vadd.f32 %v1266_v33, %v1742_v12 }
 0x102   :  { %1318 = vmatmul.mubr.f32.gmra.mxu1 %v326_v1  ;;  %v304_v37 = vpop.f32.mrf.mxu1 }
 0x103   :  { %v327_v6 = vmax.f32 %v225_v5, 0.0  ;;  %v305_v39 = vadd.f32 %v1742_v12, %v304_v37  ;;  %v344_v45 = vmax.f32 %v310_v44, 0.0  ;;  %v626_v12 = vld [vmem:[%s1932_s5 + $0x8] sm:$0xff] }
 0x104   :  { %1375 = vmatprep.subr.mxu0 %v626_v12 }
 0x105   :  { %1320 = vmatprep.mubr.f32.mxu1 %v327_v6  ;;  %v343_v42 = vmax.f32 %v305_v39, 0.0  ;;  %1376 = vmatpush3.msra.mxu0 %v626_v12 }
 0x106   :  { %1321 = vmatmul.mubr.f32.gmra.mxu1 %v328_v9  ;;  %1377 = vmatprep.subr.mxu0 %v625_v48 }
 0x107   :  { %1323 = vmatprep.mubr.f32.mxu1 %v329_v7  ;;  %1378 = vmatpush3.msra.mxu0 %v625_v48 }
 0x10a   :  { %1324 = vmatmul.mubr.f32.gmra.mxu1 %v330_v15 }
 0x10b   :  { %1326 = vmatprep.mubr.f32.mxu1 %v331_v13 }
 0x10e   :  { %1327 = vmatmul.mubr.f32.gmra.mxu1 %v332_v21 }
 0x10f   :  { %1329 = vmatprep.mubr.f32.mxu1 %v333_v19 }
 0x112   :  { %1330 = vmatmul.mubr.f32.gmra.mxu1 %v334_v26 }
 0x113   :  { %1332 = vmatprep.mubr.f32.mxu1 %v335_v23 }
 0x116   :  { %1333 = vmatmul.mubr.f32.gmra.mxu1 %v336_v30 }
 0x117   :  { %1335 = vmatprep.mubr.f32.mxu1 %v337_v28 }
 0x11a   :  { %1336 = vmatmul.mubr.f32.gmra.mxu1 %v338_v35 }
 0x11b   :  { %1338 = vmatprep.mubr.f32.mxu1 %v339_v32 }
 0x11e   :  { %1339 = vmatmul.mubr.f32.gmra.mxu1 %v340_v40 }
 0x11f   :  { %1341 = vmatprep.mubr.f32.mxu1 %v341_v38 }
 0x122   :  { %1342 = vmatmul.mubr.f32.gmra.mxu1 %v342_v43 }
 0x123   :  { %1344 = vmatprep.mubr.f32.mxu1 %v343_v42 }
 0x126   :  { %1345 = vmatmul.mubr.f32.gmra.mxu1 %v344_v45 }
 0x1aa   :  { %v1301_v50 = vpop.f32.mrf.mxu1 }
 0x1ab   :  { %v440_v51 = vadd.f32 %v1301_v50, %v1800_v49 }
 0x1ac   :  { %v434_v52 = vpop.f32.mrf.mxu1 }
 0x1ad   :  { %v435_v53 = vadd.f32 %v1800_v49, %v434_v52  ;;  %v594_v56 = vmax.f32 %v440_v51, 0.0 }
 0x1ae   :  { %v1304_v54 = vpop.f32.mrf.mxu1 }
 0x1af   :  { %v593_v55 = vmax.f32 %v435_v53, 0.0  ;;  %v450_v57 = vadd.f32 %v1304_v54, %v1800_v49 }
 0x1b0   :  { %v444_v58 = vpop.f32.mrf.mxu1 }
 0x1b1   :  { %v445_v59 = vadd.f32 %v1800_v49, %v444_v58  ;;  %1379 = vmatprep.mubr.f32.mxu0 %v593_v55  ;;  %v596_v62 = vmax.f32 %v450_v57, 0.0 }
 0x1b2   :  { %v1307_v60 = vpop.f32.mrf.mxu1  ;;  %1380 = vmatmul.mubr.f32.vlgmr.msra.gmra.mxu0 %v594_v56 }
 0x1b3   :  { %v595_v61 = vmax.f32 %v445_v59, 0.0  ;;  %v460_v63 = vadd.f32 %v1307_v60, %v1800_v49 }
 0x1b4   :  { %v454_v0 = vpop.f32.mrf.mxu1 }
 0x1b5   :  { %v455_v1 = vadd.f32 %v1800_v49, %v454_v0  ;;  %1382 = vmatprep.mubr.f32.mxu0 %v595_v61  ;;  %v598_v4 = vmax.f32 %v460_v63, 0.0 }
 0x1b6   :  { %v1310_v2 = vpop.f32.mrf.mxu1  ;;  %1383 = vmatmul.mubr.f32.gmra.mxu0 %v596_v62 }
 0x1b7   :  { %v597_v3 = vmax.f32 %v455_v1, 0.0  ;;  %v470_v5 = vadd.f32 %v1310_v2, %v1800_v49 }
 0x1b8   :  { %v464_v6 = vpop.f32.mrf.mxu1 }
 0x1b9   :  { %v465_v7 = vadd.f32 %v1800_v49, %v464_v6  ;;  %1385 = vmatprep.mubr.f32.mxu0 %v597_v3  ;;  %v600_v10 = vmax.f32 %v470_v5, 0.0 }
 0x1ba   :  { %v1313_v8 = vpop.f32.mrf.mxu1  ;;  %1386 = vmatmul.mubr.f32.gmra.mxu0 %v598_v4 }
 0x1bb   :  { %v599_v9 = vmax.f32 %v465_v7, 0.0  ;;  %v480_v11 = vadd.f32 %v1313_v8, %v1800_v49 }
 0x1bc   :  { %v474_v13 = vpop.f32.mrf.mxu1 }
 0x1bd   :  { %v475_v14 = vadd.f32 %v1800_v49, %v474_v13  ;;  %1388 = vmatprep.mubr.f32.mxu0 %v599_v9  ;;  %v602_v18 = vmax.f32 %v480_v11, 0.0 }
 0x1be   :  { %v1316_v15 = vpop.f32.mrf.mxu1  ;;  %1389 = vmatmul.mubr.f32.gmra.mxu0 %v600_v10 }
 0x1bf   :  { %v601_v17 = vmax.f32 %v475_v14, 0.0  ;;  %v490_v19 = vadd.f32 %v1316_v15, %v1800_v49 }
 0x1c0   :  { %v484_v20 = vpop.f32.mrf.mxu1 }
 0x1c1   :  { %v485_v21 = vadd.f32 %v1800_v49, %v484_v20  ;;  %1391 = vmatprep.mubr.f32.mxu0 %v601_v17  ;;  %v604_v23 = vmax.f32 %v490_v19, 0.0 }
 0x1c2   :  { %v1319_v16 = vpop.f32.mrf.mxu1  ;;  %1392 = vmatmul.mubr.f32.gmra.mxu0 %v602_v18 }
 0x1c3   :  { %v603_v22 = vmax.f32 %v485_v21, 0.0  ;;  %v500_v25 = vadd.f32 %v1319_v16, %v1800_v49  ;;  %v1837_v21 = vld [vmem:[%s1935_s7] sm:$0x1] }
 0x1c4   :  { %v494_v26 = vpop.f32.mrf.mxu1  ;;  %1185 = vmatprep.mubr.f32.mxu1 %v1837_v21 }
 0x1c5   :  { %v495_v27 = vadd.f32 %v1800_v49, %v494_v26  ;;  %1394 = vmatprep.mubr.f32.mxu0 %v603_v22  ;;  %v606_v29 = vmax.f32 %v500_v25, 0.0 }
 0x1c6   :  { %v1322_v24 = vpop.f32.mrf.mxu1  ;;  %1395 = vmatmul.mubr.f32.gmra.mxu0 %v604_v23 }
 0x1c7   :  { %v605_v28 = vmax.f32 %v495_v27, 0.0  ;;  %v510_v30 = vadd.f32 %v1322_v24, %v1800_v49 }
 0x1c8   :  { %v504_v31 = vpop.f32.mrf.mxu1 }
 0x1c9   :  { %v505_v33 = vadd.f32 %v1800_v49, %v504_v31  ;;  %1397 = vmatprep.mubr.f32.mxu0 %v605_v28  ;;  %v608_v35 = vmax.f32 %v510_v30, 0.0 }
 0x1ca   :  { %v1325_v32 = vpop.f32.mrf.mxu1  ;;  %1398 = vmatmul.mubr.f32.gmra.mxu0 %v606_v29 }
 0x1cb   :  { %v607_v34 = vmax.f32 %v505_v33, 0.0  ;;  %v520_v36 = vadd.f32 %v1325_v32, %v1800_v49 }
 0x1cc   :  { %v514_v37 = vpop.f32.mrf.mxu1 }
 0x1cd   :  { %v515_v38 = vadd.f32 %v1800_v49, %v514_v37  ;;  %1400 = vmatprep.mubr.f32.mxu0 %v607_v34  ;;  %v610_v41 = vmax.f32 %v520_v36, 0.0 }
 0x1ce   :  { %v1328_v39 = vpop.f32.mrf.mxu1  ;;  %1401 = vmatmul.mubr.f32.gmra.mxu0 %v608_v35 }
 0x1cf   :  { %v609_v40 = vmax.f32 %v515_v38, 0.0  ;;  %v530_v42 = vadd.f32 %v1328_v39, %v1800_v49 }
 0x1d0   :  { %v524_v43 = vpop.f32.mrf.mxu1 }
 0x1d1   :  { %v525_v44 = vadd.f32 %v1800_v49, %v524_v43  ;;  %1403 = vmatprep.mubr.f32.mxu0 %v609_v40  ;;  %v612_v47 = vmax.f32 %v530_v42, 0.0 }
 0x1d2   :  { %v1331_v45 = vpop.f32.mrf.mxu1  ;;  %1404 = vmatmul.mubr.f32.gmra.mxu0 %v610_v41 }
 0x1d3   :  { %v611_v46 = vmax.f32 %v525_v44, 0.0  ;;  %v540_v12 = vadd.f32 %v1331_v45, %v1800_v49 }
 0x1d4   :  { %v534_v48 = vpop.f32.mrf.mxu1 }
 0x1d5   :  { %v535_v50 = vadd.f32 %v1800_v49, %v534_v48  ;;  %1406 = vmatprep.mubr.f32.mxu0 %v611_v46  ;;  %v614_v53 = vmax.f32 %v540_v12, 0.0 }
 0x1d6   :  { %v1334_v51 = vpop.f32.mrf.mxu1  ;;  %1407 = vmatmul.mubr.f32.gmra.mxu0 %v612_v47 }
 0x1d7   :  { %v613_v52 = vmax.f32 %v535_v50, 0.0  ;;  %v550_v54 = vadd.f32 %v1334_v51, %v1800_v49  ;;  %v1873_v50 = vld [vmem:[%s1936_s6] ss:$0 sm:$0xff] }
 0x1d8   :  { %v544_v55 = vpop.f32.mrf.mxu1 }
 0x1d9   :  { %v545_v56 = vadd.f32 %v1800_v49, %v544_v55  ;;  %1409 = vmatprep.mubr.f32.mxu0 %v613_v52  ;;  %v616_v59 = vmax.f32 %v550_v54, 0.0 }
 0x1da   :  { %v1337_v57 = vpop.f32.mrf.mxu1  ;;  %1410 = vmatmul.mubr.f32.gmra.mxu0 %v614_v53 }
 0x1db   :  { %v615_v58 = vmax.f32 %v545_v56, 0.0  ;;  %v560_v60 = vadd.f32 %v1337_v57, %v1800_v49 }
 0x1dc   :  { %v554_v61 = vpop.f32.mrf.mxu1 }
 0x1dd   :  { %v555_v62 = vadd.f32 %v1800_v49, %v554_v61  ;;  %1412 = vmatprep.mubr.f32.mxu0 %v615_v58  ;;  %v618_v1 = vmax.f32 %v560_v60, 0.0 }
 0x1de   :  { %v1340_v63 = vpop.f32.mrf.mxu1  ;;  %1413 = vmatmul.mubr.f32.gmra.mxu0 %v616_v59 }
 0x1df   :  { %v617_v0 = vmax.f32 %v555_v62, 0.0  ;;  %v570_v2 = vadd.f32 %v1340_v63, %v1800_v49 }
 0x1e0   :  { %v564_v3 = vpop.f32.mrf.mxu1 }
 0x1e1   :  { %v565_v4 = vadd.f32 %v1800_v49, %v564_v3  ;;  %1415 = vmatprep.mubr.f32.mxu0 %v617_v0  ;;  %v620_v7 = vmax.f32 %v570_v2, 0.0 }
 0x1e2   :  { %v1343_v5 = vpop.f32.mrf.mxu1  ;;  %1416 = vmatmul.mubr.f32.gmra.mxu0 %v618_v1 }
 0x1e3   :  { %v619_v6 = vmax.f32 %v565_v4, 0.0  ;;  %v580_v8 = vadd.f32 %v1343_v5, %v1800_v49 }
 0x1e4   :  { %v574_v9 = vpop.f32.mrf.mxu1 }
 0x1e5   :  { %v575_v10 = vadd.f32 %v1800_v49, %v574_v9  ;;  %1418 = vmatprep.mubr.f32.mxu0 %v619_v6  ;;  %v622_v14 = vmax.f32 %v580_v8, 0.0 }
 0x1e6   :  { %v1346_v11 = vpop.f32.mrf.mxu1  ;;  %1419 = vmatmul.mubr.f32.gmra.mxu0 %v620_v7 }
 0x1e7   :  { %v621_v13 = vmax.f32 %v575_v10, 0.0  ;;  %v590_v15 = vadd.f32 %v1346_v11, %v1800_v49 }
 0x1e8   :  { %v584_v17 = vpop.f32.mrf.mxu1 }
 0x1e9   :  { %v585_v18 = vadd.f32 %v1800_v49, %v584_v17  ;;  %1421 = vmatprep.mubr.f32.mxu0 %v621_v13  ;;  %v624_v20 = vmax.f32 %v590_v15, 0.0 }
 0x1ea   :  { %1422 = vmatmul.mubr.f32.gmra.mxu0 %v622_v14 }
 0x1eb   :  { %v623_v19 = vmax.f32 %v585_v18, 0.0 }
 0x1ed   :  { %1424 = vmatprep.mubr.f32.mxu0 %v623_v19 }
 0x1ee   :  { %1425 = vmatmul.mubr.f32.gmra.mxu0 %v624_v20 }
 0x272   :  { %v1839_v16 = vpop.f32.mrf.mxu0 }
 0x274   :  { %v1842_v22 = vpop.f32.mrf.mxu0 }
 0x276   :  { %v1844_v23 = vpop.f32.mrf.mxu0 }
 0x278   :  { %v1846_v49 = vpop.f32.mrf.mxu0 }
 0x27a   :  { %v1848_v25 = vpop.f32.mrf.mxu0 }
 0x27c   :  { %v1850_v26 = vpop.f32.mrf.mxu0 }
 0x27e   :  { %v1852_v27 = vpop.f32.mrf.mxu0 }
 0x280   :  { %v1854_v24 = vpop.f32.mrf.mxu0 }
 0x282   :  { %v1393_v28 = vpop.f32.mrf.mxu0 }
 0x283   :  { %v760_v14 = vadd.f32 %v1393_v28, %v1873_v50 }
 0x284   :  { %v1856_v29 = vpop.f32.mrf.mxu0 }
 0x285   :  { %v882_v19 = vmax.f32 %v760_v14, 0.0  ;;  %v755_v20 = vadd.f32 %v1873_v50, %v1856_v29 }
 0x286   :  { %v1396_v30 = vpop.f32.mrf.mxu0 }
 0x287   :  { %v770_v5 = vadd.f32 %v1396_v30, %v1873_v50 }
 0x288   :  { %v764_v31 = vpop.f32.mrf.mxu0 }
 0x289   :  { %v884_v9 = vmax.f32 %v770_v5, 0.0  ;;  %v765_v10 = vadd.f32 %v1873_v50, %v764_v31 }
 0x28a   :  { %v1399_v33 = vpop.f32.mrf.mxu0 }
 0x28b   :  { %v780_v61 = vadd.f32 %v1399_v33, %v1873_v50  ;;  %v883_v15 = vmax.f32 %v765_v10, 0.0  ;;  %v750_v33 = vadd.f32 %v1852_v27, %v1873_v50 }
 0x28c   :  { %v774_v32 = vpop.f32.mrf.mxu0 }
 0x28d   :  { %v886_v1 = vmax.f32 %v780_v61, 0.0  ;;  %v775_v2 = vadd.f32 %v1873_v50, %v774_v32  ;;  %v881_v32 = vmax.f32 %v755_v20, 0.0 }
 0x28e   :  { %v1402_v34 = vpop.f32.mrf.mxu0 }
 0x28f   :  { %v790_v51 = vadd.f32 %v1402_v34, %v1873_v50  ;;  %v885_v6 = vmax.f32 %v775_v2, 0.0 }
 0x290   :  { %v784_v35 = vpop.f32.mrf.mxu0 }
 0x291   :  { %v888_v57 = vmax.f32 %v790_v51, 0.0  ;;  %v785_v58 = vadd.f32 %v1873_v50, %v784_v35  ;;  %v880_v35 = vmax.f32 %v750_v33, 0.0 }
 0x292   :  { %v1858_v36 = vpop.f32.mrf.mxu0 }
 0x293   :  { %v887_v62 = vmax.f32 %v785_v58, 0.0  ;;  %v1460_v58 = vmov 1966171168  }
 0x294   :  { %v1860_v37 = vpop.f32.mrf.mxu0 }
 0x296   :  { %v1862_v38 = vpop.f32.mrf.mxu0 }
 0x298   :  { %v1864_v39 = vpop.f32.mrf.mxu0 }
 0x29a   :  { %v1866_v40 = vpop.f32.mrf.mxu0 }
 0x29b   :  { %v820_v29 = vadd.f32 %v1866_v40, %v1873_v50  ;;  %v810_v40 = vadd.f32 %v1862_v38, %v1873_v50  ;;  %v800_v38 = vadd.f32 %v1858_v36, %v1873_v50 }
 0x29c   :  { %v1868_v41 = vpop.f32.mrf.mxu0 }
 0x29d   :  { %v892_v51 = vmax.f32 %v810_v40, 0.0 }
 0x29e   :  { %v1414_v42 = vpop.f32.mrf.mxu0 }
 0x29f   :  { %v830_v30 = vadd.f32 %v1414_v42, %v1873_v50 }
 0x2a0   :  { %v824_v43 = vpop.f32.mrf.mxu0 }
 0x2a1   :  { %v896_v28 = vmax.f32 %v830_v30, 0.0  ;;  %v825_v34 = vadd.f32 %v1873_v50, %v824_v43  ;;  %v815_v43 = vadd.f32 %v1873_v50, %v1868_v41  ;;  %v805_v41 = vadd.f32 %v1873_v50, %v1864_v39 }
 0x2a2   :  { %v1417_v44 = vpop.f32.mrf.mxu0  ;;  %v795_v39 = vadd.f32 %v1873_v50, %v1860_v37  ;;  %v907_v37 = vstv %s1937_s8 }
 0x2a3   :  { %v840_v11 = vadd.f32 %v1417_v44, %v1873_v50  ;;  %v745_v44 = vadd.f32 %v1873_v50, %v1854_v24  ;;  %v895_v42 = vmax.f32 %v825_v34, 0.0  ;;  %v735_v24 = vadd.f32 %v1873_v50, %v1850_v26 }
 0x2a4   :  { %v834_v45 = vpop.f32.mrf.mxu0  ;;  %v725_v26 = vadd.f32 %v1873_v50, %v1846_v49  ;;  %v715_v49 = vadd.f32 %v1873_v50, %v1842_v22 }
 0x2a5   :  { %v898_v17 = vmax.f32 %v840_v11, 0.0  ;;  %v835_v18 = vadd.f32 %v1873_v50, %v834_v45  ;;  %v740_v45 = vadd.f32 %v1848_v25, %v1873_v50  ;;  %v879_v27 = vmax.f32 %v745_v44, 0.0 }
 0x2a6   :  { %v1420_v46 = vpop.f32.mrf.mxu0  ;;  %v730_v25 = vadd.f32 %v1844_v23, %v1873_v50  ;;  %v720_v23 = vadd.f32 %v1839_v16, %v1873_v50  ;;  %v873_v36 = vmax.f32 %v715_v49, 0.0  ;;  %v983_v16 = vunpack.c.l.s4 %v1460_v58 }
 0x2a7   :  { %v850_v3 = vadd.f32 %v1420_v46, %v1873_v50  ;;  %v897_v31 = vmax.f32 %v835_v18, 0.0  ;;  %v894_v46 = vmax.f32 %v820_v29, 0.0 }
 0x2a8   :  { %v844_v47 = vpop.f32.mrf.mxu0 }
 0x2a9   :  { %v900_v7 = vmax.f32 %v850_v3, 0.0  ;;  %v845_v8 = vadd.f32 %v1873_v50, %v844_v47  ;;  %v878_v47 = vmax.f32 %v740_v45, 0.0 }
 0x2aa   :  { %v1423_v12 = vpop.f32.mrf.mxu0 }
 0x2ab   :  { %v860_v59 = vadd.f32 %v1423_v12, %v1873_v50  ;;  %v899_v13 = vmax.f32 %v845_v8, 0.0  ;;  %v893_v12 = vmax.f32 %v815_v43, 0.0 }
 0x2ac   :  { %v854_v48 = vpop.f32.mrf.mxu0 }
 0x2ad   :  { %v902_v63 = vmax.f32 %v860_v59, 0.0  ;;  %v855_v0 = vadd.f32 %v1873_v50, %v854_v48  ;;  %v877_v48 = vmax.f32 %v735_v24, 0.0  ;;  %v985_v59 = vlaneseq }
 0x2ae   :  { %v1426_v52 = vpop.f32.mrf.mxu0 }
 0x2af   :  { %v870_v53 = vadd.f32 %v1426_v52, %v1873_v50  ;;  %v901_v4 = vmax.f32 %v855_v0, 0.0  ;;  %v876_v52 = vmax.f32 %v730_v25, 0.0  ;;  %v986_v61 = vshrl.u32 %v985_v59, 7 }
 0x2b0   :  { %v864_v54 = vpop.f32.mrf.mxu0  ;;  %vm999_vm0 = vcmp.lt.s32.totalorder %v985_v59, 256 }
 0x2b1   :  { %v904_v55 = vmax.f32 %v870_v53, 0.0  ;;  %v865_v56 = vadd.f32 %v1873_v50, %v864_v54  ;;  %v891_v53 = vmax.f32 %v805_v41, 0.0  ;;  %v875_v54 = vmax.f32 %v725_v26, 0.0 }
 0x2b3   :  { %v903_v60 = vmax.f32 %v865_v56, 0.0  ;;  %1153 = vmatprep.subr.mxu1 %v904_v55  ;;  %v890_v55 = vmax.f32 %v800_v38, 0.0  ;;  %v874_v56 = vmax.f32 %v720_v23, 0.0 }
 0x2b4   :  { %1154 = vmatpush3.xpose.msra.mxu1 %v888_v57  ;;  %v889_v57 = vmax.f32 %v795_v39, 0.0 }
 0x2b5   :  { %1155 = vmatprep.subr.mxu1 %v903_v60  ;;  %v984_v60 = vunpack.c.0.s8 %v983_v16 }
 0x2b7   :  { %v987_v50 = vsub.s32 %v984_v60, %v986_v61 }
 0x2b8   :  { %1156 = vmatpush3.xpose.msra.mxu1 %v887_v62 }
 0x2b9   :  { %1157 = vmatprep.subr.mxu1 %v902_v63 }
 0x2bc   :  { %1158 = vmatpush3.xpose.msra.mxu1 %v886_v1 }
 0x2bd   :  { %1159 = vmatprep.subr.mxu1 %v901_v4 }
 0x2c0   :  { %1160 = vmatpush3.xpose.msra.mxu1 %v885_v6 }
 0x2c1   :  { %1161 = vmatprep.subr.mxu1 %v900_v7 }
 0x2c4   :  { %1162 = vmatpush3.xpose.msra.mxu1 %v884_v9 }
 0x2c5   :  { %1163 = vmatprep.subr.mxu1 %v899_v13 }
 0x2c8   :  { %1164 = vmatpush3.xpose.msra.mxu1 %v883_v15 }
 0x2c9   :  { %1165 = vmatprep.subr.mxu1 %v898_v17 }
 0x2cc   :  { %1166 = vmatpush3.xpose.msra.mxu1 %v882_v19 }
 0x2cd   :  { %1167 = vmatprep.subr.mxu1 %v897_v31 }
 0x2d0   :  { %1168 = vmatpush3.xpose.msra.mxu1 %v881_v32 }
 0x2d1   :  { %1169 = vmatprep.subr.mxu1 %v896_v28 }
 0x2d4   :  { %1170 = vmatpush3.xpose.msra.mxu1 %v880_v35 }
 0x2d5   :  { %1171 = vmatprep.subr.mxu1 %v895_v42 }
 0x2d8   :  { %1172 = vmatpush3.xpose.msra.mxu1 %v879_v27 }
 0x2d9   :  { %1173 = vmatprep.subr.mxu1 %v894_v46 }
 0x2dc   :  { %1174 = vmatpush3.xpose.msra.mxu1 %v878_v47 }
 0x2dd   :  { %1175 = vmatprep.subr.mxu1 %v893_v12 }
 0x2e0   :  { %1176 = vmatpush3.xpose.msra.mxu1 %v877_v48 }
 0x2e1   :  { %1177 = vmatprep.subr.mxu1 %v892_v51 }
 0x2e4   :  { %1178 = vmatpush3.xpose.msra.mxu1 %v876_v52 }
 0x2e5   :  { %1179 = vmatprep.subr.mxu1 %v891_v53 }
 0x2e8   :  { %1180 = vmatpush3.xpose.msra.mxu1 %v875_v54 }
 0x2e9   :  { %1181 = vmatprep.subr.mxu1 %v890_v55 }
 0x2ec   :  { %1182 = vmatpush3.xpose.msra.mxu1 %v874_v56 }
 0x2ed   :  { %1183 = vmatprep.subr.mxu1 %v889_v57 }
 0x2f0   :  { %1184 = vmatpush3.xpose.msra.mxu1 %v873_v36 }
 0x2f3   :  { %1186 = vmatmul.mubr.f32.vlgmr.msra.gmra.mxu1 %v1837_v21 }
 0x3b3   :  { %v974_v62 = vpop.f32.mrf.mxu1 }
 0x3b4   :  { %v975_v0 = vadd.f32 %v974_v62, %v907_v37 }
 0x3b5   :  { %v976_v63 = vpop.f32.mrf.mxu1 }
 0x3b6   :  { %v977_v22 = vadd.f32 %v976_v63, %v907_v37 }
 0x3b8   :  { %v981_v1 = vcombine.low %v975_v0, %v977_v22 }
 0x3ba   :  { %v988_v2 = vrot.slane %v981_v1, %v987_v50 }
 0x3bc   :  { %v995_v3 = vrot.slane %v988_v2, %v987_v50 }
 0x3be   :  { %1001 = vst.msk [vmem:[%s1938_s9] sm:$0x3] %vm999_vm0, %v995_v3 }

</bundles_post_ra>
